<compile_context>
chip_gen: v5e
topology: v5e:2x2
jax: 0.10.0
libtpu: 0.0.40
codegen_flags: <defaults>
</compile_context>

<pallas_src>
import functools

import numpy as np
import jax
import jax.numpy as jnp
from jax.experimental import pallas as pl
from jax.experimental.pallas import tpu as pltpu

_VMEM_LIMIT = 32 * 1024 * 1024


# -----------------------------------------------------------------------------
# norm_tensor: per-batch (x - min) / (max - min + 0.01)
# -----------------------------------------------------------------------------
def _fused_norm_kernel(x_ref, o_ref, *, n_valid, rows, need_mask):
    """Fused single pass: whole per-batch slab in VMEM; min/max + normalize."""
    x = x_ref[0]                                            # (rows, 128) f32
    if need_mask:
        # Mask the zero-padded tail lanes out of the reduction.
        row = jax.lax.broadcasted_iota(jnp.int32, (rows, 128), 0)
        lane = jax.lax.broadcasted_iota(jnp.int32, (rows, 128), 1)
        valid = (row * 128 + lane) < n_valid
        mn = jnp.min(jnp.where(valid, x, jnp.inf))
        mx = jnp.max(jnp.where(valid, x, -jnp.inf))
    else:
        mn = jnp.min(x)
        mx = jnp.max(x)
    inv = 1.0 / (mx - mn + 0.01)                            # once per batch
    o_ref[0] = ((x_ref[0] - mn) * inv).astype(o_ref.dtype)


def _minmax_kernel(x_ref, stats_ref, mn_sc, mx_sc, *, n_valid, chunk_rows,
                   need_mask):
    """Two-pass fallback, pass 1: running per-batch min/max over chunks.

    Per-chunk work is vreg-wise (pure vld + VALU, co-issues under the DMA);
    the cross-sublane/cross-lane reduce + reciprocal run only in the
    last-chunk finalize.  NOTE: correctness of the resident `stats_ref`
    accumulator relies on the reduction (chunk) axis staying the innermost
    grid axis -- keep grid=(B, nck) ordering.
    """
    c = pl.program_id(1)

    @pl.when(c == 0)
    def _():
        mn_sc[...] = jnp.full(mn_sc.shape, jnp.inf, jnp.float32)
        mx_sc[...] = jnp.full(mx_sc.shape, -jnp.inf, jnp.float32)

    x = x_ref[0]                                            # (chunk_rows, 128)
    if need_mask:
        # Mask both the zero-padded tail lanes and the OOB rows of a partial
        # trailing chunk (Pallas does not mask OOB block-edge reads).
        row = jax.lax.broadcasted_iota(jnp.int32, (chunk_rows, 128), 0)
        lane = jax.lax.broadcasted_iota(jnp.int32, (chunk_rows, 128), 1)
        flat = (c * chunk_rows + row) * 128 + lane
        valid = flat < n_valid
        x_lo = jnp.where(valid, x, jnp.inf)
        x_hi = jnp.where(valid, x, -jnp.inf)
    else:
        x_lo, x_hi = x, x

    if chunk_rows % 8 == 0:
        # vreg-wise partial reduce onto the (8,128) running scratch (VALU only)
        part_mn = jnp.min(x_lo.reshape(chunk_rows // 8, 8, 128), axis=0)
        part_mx = jnp.max(x_hi.reshape(chunk_rows // 8, 8, 128), axis=0)
    else:
        part_mn = jnp.min(x_lo, axis=0, keepdims=True)      # (1,128) broadcast
        part_mx = jnp.max(x_hi, axis=0, keepdims=True)
    mn_sc[...] = jnp.minimum(mn_sc[...], part_mn)
    mx_sc[...] = jnp.maximum(mx_sc[...], part_mx)

    @pl.when(c == pl.num_programs(1) - 1)
    def _():
        mn = jnp.min(mn_sc[...])
        mx = jnp.max(mx_sc[...])
        inv = 1.0 / (mx - mn + 0.01)
        stats_ref[0, 0:1, :] = jnp.full((1, 128), mn, jnp.float32)
        stats_ref[0, 1:2, :] = jnp.full((1, 128), inv, jnp.float32)


def _apply_kernel(x_ref, stats_ref, o_ref):
    """Two-pass fallback, pass 2: (x - min) * inv with per-batch SMEM scalars."""
    b = pl.program_id(0)
    mn = stats_ref[b, 0]                                    # SMEM scalar
    inv = stats_ref[b, 1]
    o_ref[0] = ((x_ref[0] - mn) * inv).astype(o_ref.dtype)


def _pick_chunk_rows(rows, target):
    """Chunk row count: multiple of 8 (or full extent if it already fits)."""
    target = max(8, (int(target) // 8) * 8)
    if rows <= target:
        return rows
    return target


def norm_tensor_pallas(img, out_dtype=jnp.float32, chunk_rows=2048,
                       fuse_limit_bytes=4 * 1024 * 1024):
    """Exact equivalent of norm_tensor() for NCDHW input.

    - per-batch slab <= fuse_limit_bytes: fused single pass (1 read + 1 write).
    - otherwise: chunked two-pass (reduce -> per-batch SMEM scalars -> apply)
      with ~1 MiB tiles by default.
    No pad copy when the per-batch element count is a multiple of 128 (true for
    realistic voxel volumes).
    """
    B = img.shape[0]
    N = int(np.prod(img.shape[1:]))
    x2d = img.reshape(B, N).astype(jnp.float32)

    pad = (-N) % 128
    if pad:
        # TODO(synk): rare non-lane-aligned volumes pay one small pad copy; the
        # padded lanes are masked out of the min/max inside the kernels.
        x2d = jnp.pad(x2d, ((0, 0), (0, pad)))
    Np = N + pad
    R = Np // 128
    x3d = x2d.reshape(B, R, 128)                            # free reshape

    slab_bytes = R * 128 * 4

    if slab_bytes <= fuse_limit_bytes:
        # --- fused single pass --------------------------------------------
        out3d = pl.pallas_call(
            functools.partial(_fused_norm_kernel, n_valid=N, rows=R,
                              need_mask=(pad != 0)),
            out_shape=jax.ShapeDtypeStruct((B, R, 128), out_dtype),
            grid=(B,),
            in_specs=[pl.BlockSpec((1, R, 128), lambda b: (b, 0, 0))],
            out_specs=pl.BlockSpec((1, R, 128), lambda b: (b, 0, 0)),
            compiler_params=pltpu.CompilerParams(
                dimension_semantics=("parallel",),
                vmem_limit_bytes=_VMEM_LIMIT),
        )(x3d)
    else:
        # --- chunked two-pass fallback --------------------------------------
        CH = _pick_chunk_rows(R, chunk_rows)
        nck = -(-R // CH)
        need_mask = (pad != 0) or (R % CH != 0)

        stats_slab = pl.pallas_call(
            functools.partial(_minmax_kernel, n_valid=N, chunk_rows=CH,
                              need_mask=need_mask),
            out_shape=jax.ShapeDtypeStruct((B, 2, 128), jnp.float32),
            grid=(B, nck),
            in_specs=[pl.BlockSpec((1, CH, 128), lambda b, c: (b, c, 0))],
            out_specs=pl.BlockSpec((1, 2, 128), lambda b, c: (b, 0, 0)),
            scratch_shapes=[pltpu.VMEM((8, 128), jnp.float32),
                            pltpu.VMEM((8, 128), jnp.float32)],
            compiler_params=pltpu.CompilerParams(
                dimension_semantics=("parallel", "arbitrary"),
                vmem_limit_bytes=_VMEM_LIMIT),
        )(x3d)
        # Per-batch [min, 1/(max-min+0.01)] handed to pass 2 through SMEM
        # (no broadcast slabs / per-step stat block DMAs).
        stats = stats_slab[:, :, 0]                          # (B, 2) f32

        out3d = pl.pallas_call(
            _apply_kernel,
            out_shape=jax.ShapeDtypeStruct((B, R, 128), out_dtype),
            grid=(B, nck),
            in_specs=[pl.BlockSpec((1, CH, 128), lambda b, c: (b, c, 0)),
                      pl.BlockSpec(memory_space=pltpu.MemorySpace.SMEM)],
            out_specs=pl.BlockSpec((1, CH, 128), lambda b, c: (b, c, 0)),
            compiler_params=pltpu.CompilerParams(
                dimension_semantics=("parallel", "parallel"),
                vmem_limit_bytes=_VMEM_LIMIT),
        )(x3d, stats)

    out2d = out3d.reshape(B, Np)
    if pad:
        out2d = out2d[:, :N]
    return out2d.reshape(img.shape)


# -----------------------------------------------------------------------------
# regressor tail (Linear+BN+ReLU x2, BN folded) + fused shape_end1/shape_end2
# -----------------------------------------------------------------------------
def _head_kernel(f_ref, w1_ref, b1_ref, w2_ref, b2_ref, wh_ref, bh_ref, o_ref):
    # NOTE: bf16 weights/activations diverge ~1e-2 rel. from an f32 torch
    # reference once real (non-zero) head weights are loaded.
    f = f_ref[...].astype(jnp.bfloat16)                                # (bm,1024)
    # Linear(1024,400)+BN1d(400)+ReLU, BN folded into w1/b1, lane-padded to 512
    h1 = jnp.dot(f, w1_ref[...], preferred_element_type=jnp.float32) + b1_ref[...]
    h1 = jnp.maximum(h1, 0.0).astype(jnp.bfloat16)                     # (bm, 512)
    # Linear(400,200)+BN1d(200)+ReLU, BN folded, lane-padded to 256
    h2 = jnp.dot(h1, w2_ref[...], preferred_element_type=jnp.float32) + b2_ref[...]
    h2 = jnp.maximum(h2, 0.0).astype(jnp.bfloat16)                     # (bm, 256)
    # Fused heads (lane-padded to 128): cols 0:3 -> tanh, col 3 -> sigmoid
    z = jnp.dot(h2, wh_ref[...], preferred_element_type=jnp.float32) + bh_ref[...]
    col = jax.lax.broadcasted_iota(jnp.int32, z.shape, 1)
    o_ref[...] = jnp.where(col < 3, jnp.tanh(z), jax.nn.sigmoid(z))


def shape_heads_pallas(feat, params):
    B = feat.shape[0]
    w1, b1, w2, b2, wh, bh = params

    # Batch-parallel grid: weights stay resident (constant index_map); large
    # batches split across rows -> both TCs on v7x work concurrently.
    bm = B if B <= 128 else 128
    grid = (-(-B // bm),)

    def resident(arr):
        nd = arr.ndim
        return pl.BlockSpec(arr.shape, lambda i, _nd=nd: (0,) * _nd)

    out = pl.pallas_call(
        _head_kernel,
        out_shape=jax.ShapeDtypeStruct((B, 128), jnp.float32),
        grid=grid,
        in_specs=[pl.BlockSpec((bm, 1024), lambda i: (i, 0)),
                  resident(w1), resident(b1), resident(w2), resident(b2),
                  resident(wh), resident(bh)],
        out_specs=pl.BlockSpec((bm, 128), lambda i: (i, 0)),
        compiler_params=pltpu.CompilerParams(
            dimension_semantics=("parallel",),
            vmem_limit_bytes=_VMEM_LIMIT),
    )(feat, w1, b1, w2, b2, wh, bh)
    par1 = out[:, 0:3]     # shape_end1 output (tanh)
    par2 = out[:, 3:4]     # shape_end2 output (sigmoid)
    return par1, par2


# -----------------------------------------------------------------------------
# Deterministic parameters mirroring the module's __init__ (BN folded, padded)
# -----------------------------------------------------------------------------
def init_params(key):
    k1, k2 = jax.random.split(key, 2)
    eps = 1e-5
    bn_scale = 1.0 / np.sqrt(1.0 + eps)   # eval-mode BN: gamma=1, beta=0, mean=0, var=1

    # Linear(1024,400) / Linear(400,200): deterministic random weights, zero bias.
    w1 = 0.02 * jax.random.normal(k1, (1024, 400), jnp.float32) * bn_scale
    b1 = jnp.zeros((400,), jnp.float32)
    w2 = 0.02 * jax.random.normal(k2, (400, 200), jnp.float32) * bn_scale
    b2 = jnp.zeros((200,), jnp.float32)

    # Lane-pad: 400 -> 512, 200 -> 256 (padded rows/cols are zero, ReLU-safe).
    w1p = jnp.zeros((1024, 512), jnp.float32).at[:, :400].set(w1)
    b1p = jnp.zeros((1, 512), jnp.float32).at[0, :400].set(b1)
    w2p = jnp.zeros((512, 256), jnp.float32).at[:400, :200].set(w2)
    b2p = jnp.zeros((1, 256), jnp.float32).at[0, :200].set(b2)

    # shape_end1: Linear(200,3) weight=0, bias=[0,0,0]
    # shape_end2: Linear(200,1) weight=0, bias=[-1.1838]
    # Fused + lane-padded to 128 output columns.
    wh = jnp.zeros((256, 128), jnp.float32)
    bh = jnp.zeros((1, 128), jnp.float32).at[0, 3].set(-1.1838)

    # Weights shipped as bf16 (MXU-native); biases stay f32.
    # TODO(synk): int8 weights with folded per-channel scales would halve the
    # weight DMA on v5e/v6e if this head ever becomes throughput-relevant.
    return (w1p.astype(jnp.bfloat16), b1p,
            w2p.astype(jnp.bfloat16), b2p,
            wh.astype(jnp.bfloat16), bh)


# -----------------------------------------------------------------------------
if __name__ == "__main__":
    key = jax.random.PRNGKey(0)
    k_img, k_img2, k_feat, k_par = jax.random.split(key, 4)

    # Small shapes consistent with the module: 1-channel 3D voxel volume.
    B, C, D, H, W = 2, 1, 16, 16, 16
    img = jax.random.normal(k_img, (B, C, D, H, W), jnp.float32)

    # 1a) x = norm_tensor(img): fused single-pass path (per-batch slab in VMEM)
    x_norm = norm_tensor_pallas(img)

    flat = img.reshape(B, -1)
    ref = (flat - flat.min(axis=1, keepdims=True)) / (
        flat.max(axis=1, keepdims=True) - flat.min(axis=1, keepdims=True) + 0.01
    )
    assert np.allclose(np.asarray(x_norm).reshape(B, -1), np.asarray(ref),
                       rtol=1e-5, atol=1e-5)

    # 1b) exercise the chunked two-pass fallback (large-volume path) on a small
    #     ragged volume (forces the lane-pad mask + a partial trailing chunk).
    img2 = jax.random.normal(k_img2, (B, 1, 10, 12, 12), jnp.float32)
    x_norm2 = norm_tensor_pallas(img2, fuse_limit_bytes=0, chunk_rows=8)
    flat2 = img2.reshape(B, -1)
    ref2 = (flat2 - flat2.min(axis=1, keepdims=True)) / (
        flat2.max(axis=1, keepdims=True) - flat2.min(axis=1, keepdims=True) + 0.01
    )
    assert np.allclose(np.asarray(x_norm2).reshape(B, -1), np.asarray(ref2),
                       rtol=1e-5, atol=1e-5)

    # TODO(synk): Encoder backbone + Conv3d/MaxPool3d regressor front-end are
    # undefined in the provided source; use a deterministic stand-in feature.
    feat = jax.random.normal(k_feat, (B, 1024), jnp.float32)

    # 2) regressor tail + shape_end1 / shape_end2 heads (single MXU kernel)
    params = init_params(k_par)
    out_par1, out_par2 = shape_heads_pallas(feat, params)

    jax.block_until_ready((x_norm, x_norm2, out_par1, out_par2))

    # With zeroed head weights: par1 == tanh(0) == 0, par2 == sigmoid(-1.1838).
    assert out_par1.shape == (B, 3) and out_par2.shape == (B, 1)
    assert np.allclose(np.asarray(out_par1), 0.0, atol=1e-6)
    assert np.allclose(np.asarray(out_par2),
                       1.0 / (1.0 + np.exp(1.1838)), atol=1e-5)

    print("KERNEL_OK")
</pallas_src>

<mosaic_0001>
module attributes {stable_mosaic.version = 11 : i64} {
  func.func @_fused_norm_kernel(%arg0: i32, %arg1: memref<1x32x128xf32, #tpu.memory_space<vmem>>, %arg2: memref<1x32x128xf32, #tpu.memory_space<vmem>>) attributes {dimension_semantics = [#tpu.dimension_semantics<parallel>], iteration_bounds = array<i64: 2>, scalar_prefetch = 0 : i64, scratch_operands = 0 : i64, tpu.core_type = #tpu.core_type<tc>, window_params = [{transform_indices = @transform_0, window_bounds = array<i64: 1, 32, 128>}, {transform_indices = @transform_1, window_bounds = array<i64: 1, 32, 128>}]} {
    %c0 = arith.constant 0 : index
    %c0_0 = arith.constant 0 : index
    %c0_1 = arith.constant 0 : index
    %0 = vector.load %arg1[%c0, %c0_0, %c0_1] : memref<1x32x128xf32, #tpu.memory_space<vmem>>, vector<1x32x128xf32>
    %1 = vector.shape_cast %0 : vector<1x32x128xf32> to vector<32x128xf32>
    %2 = vector.shape_cast %1 : vector<32x128xf32> to vector<1x32x128xf32>
    %cst = arith.constant dense<0x7F800000> : vector<1xf32>
    %3 = vector.multi_reduction <minimumf>, %2, %cst [1, 2] : vector<1x32x128xf32> to vector<1xf32>
    %4 = vector.shape_cast %3 : vector<1xf32> to vector<1x1x1xf32>
    %5 = vector.extract %4[0, 0, 0] : f32 from vector<1x1x1xf32>
    %6 = vector.shape_cast %1 : vector<32x128xf32> to vector<1x32x128xf32>
    %cst_2 = arith.constant dense<0xFF800000> : vector<1xf32>
    %7 = vector.multi_reduction <maximumf>, %6, %cst_2 [1, 2] : vector<1x32x128xf32> to vector<1xf32>
    %8 = vector.shape_cast %7 : vector<1xf32> to vector<1x1x1xf32>
    %9 = vector.extract %8[0, 0, 0] : f32 from vector<1x1x1xf32>
    %10 = arith.subf %9, %5 : f32
    %cst_3 = arith.constant 0.00999999977 : f32
    %11 = arith.addf %10, %cst_3 : f32
    %cst_4 = arith.constant 1.000000e+00 : f32
    %12 = arith.divf %cst_4, %11 : f32
    %c0_5 = arith.constant 0 : index
    %c0_6 = arith.constant 0 : index
    %c0_7 = arith.constant 0 : index
    %13 = vector.load %arg1[%c0_5, %c0_6, %c0_7] : memref<1x32x128xf32, #tpu.memory_space<vmem>>, vector<1x32x128xf32>
    %14 = vector.shape_cast %13 : vector<1x32x128xf32> to vector<32x128xf32>
    %15 = vector.broadcast %5 : f32 to vector<32x128xf32>
    %16 = arith.subf %14, %15 : vector<32x128xf32>
    %17 = vector.broadcast %12 : f32 to vector<32x128xf32>
    %18 = arith.mulf %16, %17 : vector<32x128xf32>
    %c0_8 = arith.constant 0 : index
    %c0_9 = arith.constant 0 : index
    %c0_10 = arith.constant 0 : index
    %19 = vector.load %arg2[%c0_8, %c0_9, %c0_10] : memref<1x32x128xf32, #tpu.memory_space<vmem>>, vector<1x32x128xf32>
    %20 = vector.shape_cast %19 : vector<1x32x128xf32> to vector<32x128xf32>
    %21 = vector.shape_cast %18 : vector<32x128xf32> to vector<1x32x128xf32>
    tpu.vector_store %arg2[%c0_8, %c0_9, %c0_10], %21 {strides = array<i32>} : memref<1x32x128xf32, #tpu.memory_space<vmem>>, vector<1x32x128xf32>,
    return
  }
  func.func @transform_0(%arg0: i32) -> (i32, i32, i32) {
    %c0_i32 = arith.constant 0 : i32
    %c0_i32_0 = arith.constant 0 : i32
    %c0_i32_1 = arith.constant 0 : i32
    return %arg0, %c0_i32, %c0_i32_0 : i32, i32, i32
  }
  func.func @transform_1(%arg0: i32) -> (i32, i32, i32) {
    %c0_i32 = arith.constant 0 : i32
    %c0_i32_0 = arith.constant 0 : i32
    %c0_i32_1 = arith.constant 0 : i32
    return %arg0, %c0_i32, %c0_i32_0 : i32, i32, i32
  }
}

</mosaic_0001>

<bundles_post_ra>
// kernel: tpu_custom_call.1
= control target key start
LH: loop header
LB: loop body
LE: loop exit
PB: predicated region body
PF: predicated region fallthrough
CT: control target
= control target key end

     0   :  { %6 = vsyncpa [#allocation3], 0  ;;  %s603_s0 = inlined_call_operand.hbm [shape: f32[2,32,128], index: 0, kind: input, shape index: {}]   ;;  %s604_s1 = inlined_call_operand.hbm [shape: f32[2,32,128], index: 1, kind: output, shape index: {}]  }
   0x1   :  { %8 = vsyncpa [#allocation3 + $0x1], 0 }
   0x2   :  { %9 = vsyncpa [#allocation4], 0 }
   0x3   :  { %11 = vsyncpa [#allocation4 + $0x1], 0  ;;  %s472_s6 = smov 0   ;;  %s474_s7 = smov 0  }
   0x4   :  { %s476_s8 = smov 0   ;;  %s478_s9 = smov 0  }
   0x5 LB: > { %s493_s10 = sadd.s32 4294967295, %s456_s9   ;;  %s286_s11 = sadd.s32 4294967294, %s456_s9   ;;  %s456_s9 = sphi %s478_s9, %s614_s9   ;;  %s452_s8 = sphi %s476_s8, %s613_s8   ;;  %s448_s7 = sphi %s474_s7, %s612_s7   ;;  %s444_s6 = sphi %s472_s6, %s611_s6  }
   0x6   : > { %s497_s12 = sadd.s32 1, %s456_s9   ;;  %s24_s13 = sadd.s32 1, %s452_s8 }
   0x7   : > { %s21_s14 = ssub.s32 %s456_s9, %s497_s12  ;;  %p31_p0 = scmp.ne.s32.totalorder %s452_s8, %s448_s7 }
   0x8   : > { %p22_p1 = scmp.eq.s32.totalorder %s21_s14, 0  ;;  %p32_p2 = scmp.eq.s32.totalorder %s456_s9, 0 }
   0x9   : > { %p37_p3 = scmp.ne.s32.totalorder %s448_s7, %s444_s6  ;;  %p38_p4 = scmp.eq.s32.totalorder %s493_s10, 0 }
   0xa   : > { %s509_s15 = scalar_select %p22_p1, %s452_s8, %s24_s13  }
   0xb   : > { %p511_p5 = por %p32_p2, %p31_p0  ;;  %p515_p6 = por %p38_p4, %p37_p3 }
   0xc   : > { %p61_p7 = scmp.eq.s32.totalorder %s493_s10, 1  ;;  %p67_p8 = scmp.eq.s32.totalorder %s286_s11, 1 }
   0xd   : > { %p320_p10 = scmp.lt.s32.totalorder %s456_s9, 2  ;;  %s87_s20 = sand.u32 1, %s452_s8  }
   0xe   : > { %p522_p11 = por %p61_p7, %p31_p0  ;;  %p526_p12 = por %p67_p8, %p37_p3 }
   0xf   : > { %s300_s21 = sshll.u32 %s456_s9, 5  ;;  %s289_s22 = sshll.u32 %s87_s20, 5 }
  0x10   : > { %s96_s25 = scalar_lea.hbm %s603_s0, %s300_s21  ;;  %s91_s27 = scalar_lea.vmem [#allocation2], %s289_s22 }
  0x11   : > { %s97_s26 = sshll.u32 %s96_s25, 4  ;;  %s99_s28 = sshll.u32 %s91_s27, 4  ;;  %s98_s26 = int_to_ptr.hbm [resolvable:$true] %s97_s26  ;;  %s100_s28 = int_to_ptr.vmem [resolvable:$true] %s99_s28 }
  0x12   : > { %p537_p13 = pnand %p320_p10, %p511_p5  ;;  %p292_p0 = scmp.ge.s32.totalorder %s456_s9, 1 }
  0x13   : > { %p107_p1 = scmp.lt.s32.totalorder %s456_s9, 3  ;;  %s88_s30 = scalar_lea.sflag [#allocation3], %s87_s20 }
  0x14   : > { %s360_s2 = sshra.s32 %s98_s26, 4  ;;  %p364_p3 = pneg %p537_p13  ;;  %s361_s2 = int_to_ptr.hbm [resolvable:$true] %s360_s2 }
  0x15   : > { %s362_s3 = scalar_lea.hbm %s361_s2, 32  ;;  %s367_s11 = scalar_lea.hbm %s603_s0, 64 }
  0x16   : > { %p363_p2 = scmp.ne.s32.totalorder %s361_s2, %s362_s3  ;;  %p368_p5 = scmp.lt.s32.totalorder %s361_s2, %s603_s0 }
  0x17   : > { %p369_p8 = scmp.lt.s32.totalorder %s367_s11, %s362_s3 }
  0x18   : > { %p365_p4 = pnand %p364_p3, %p363_p2 }
  0x19   : > { %p370_p10 = por %p369_p8, %p368_p5 }
  0x1a   : > { %p366_p7 = pneg %p365_p4 }
  0x1c   : > { %p371_p9 = pnand %p370_p10, %p366_p7 }
  0x1e   : > { %374 = shalt.err (!%p371_p9)
}
  0x1f   : > { %s458_s16 = smov 128   ;;  %s459_s20 = smov 8  }
  0x20   : > { %315 = dma.hbm_to_vmem [thread:$0]  (!%p537_p13), %s98_s26, 512, %s100_s28, %s88_s30, %s458_s16, %s458_s16, %s459_s20  }
  0x21   : > { %p108_p2 = pnand %p292_p0, %p107_p1 }
  0x22   : > { %s558_s21 = sand.u32 (!%p108_p2), 1, %s448_s7  }
  0x23   : > { %111 = sbr.rel (%p108_p2) target bundleno = 315 (0x13b), region = 24  ;;  %s293_s22 = sshll.u32 (!%p108_p2), %s558_s21, 5 }
  0x24   : > { %s114_s23 = scalar_lea.sflag (!%p108_p2), [#allocation3], %s558_s21  ;;  %s117_s24 = scalar_lea.vmem (!%p108_p2), [#allocation2], %s293_s22 }
  0x28   : > { %435 = dma.done.wait (%p515_p6), %s114_s23, 512  }
  0x29   : > { %437 = vsyncadd (%p515_p6), %s114_s23, 4294966784  ;;  %v137_v0 = vld [vmem:[%s117_s24] sm:$0xff]  ;;  %v138_v1 = vld [vmem:[%s117_s24 + $0x8] sm:$0xff]  ;;  %s301_s28 = sshll.u32 %s493_s10, 5  ;;  %s136_s4 = scalar_lea.vmem [#allocation5], %s293_s22 }
  0x2a   : > { %v139_v2 = vld [vmem:[%s117_s24 + $0x10] sm:$0xff]  ;;  %v140_v3 = vld [vmem:[%s117_s24 + $0x18] sm:$0xff]  ;;  %v141_v4 = vmin.f32 %v137_v0, %v138_v1  ;;  %v153_v7 = vmax.f32 %v137_v0, %v138_v1  ;;  %s209_s2 = scalar_lea.hbm %s604_s1, %s301_s28  ;;  %s210_s5 = sshll.u32 %s136_s4, 4  ;;  %s211_s5 = int_to_ptr.vmem [resolvable:$true] %s210_s5 }
  0x2b   : > { %v142_v5 = vmin.f32 %v139_v2, %v140_v3  ;;  %v154_v8 = vmax.f32 %v139_v2, %v140_v3  ;;  %s212_s11 = sshll.u32 %s209_s2, 4  ;;  %s198_s10 = scalar_lea.sflag [#allocation4], %s558_s21  ;;  %s213_s11 = int_to_ptr.hbm [resolvable:$true] %s212_s11 }
  0x2c   : > { %s404_s13 = sshra.s32 %s213_s11, 4  ;;  %s410_s22 = scalar_lea.hbm %s604_s1, 64  ;;  %s405_s13 = int_to_ptr.hbm [resolvable:$true] %s404_s13 }
  0x2d   : > { %v143_v6 = vmin.f32 %v141_v4, %v142_v5  ;;  %v155_v9 = vmax.f32 %v153_v7, %v154_v8  ;;  %s406_s14 = scalar_lea.hbm %s405_s13, 32  ;;  %p411_p0 = scmp.lt.s32.totalorder %s405_s13, %s604_s1 }
  0x2e   : > { %p407_p6 = scmp.ne.s32.totalorder %s405_s13, %s406_s14  ;;  %p412_p1 = scmp.lt.s32.totalorder %s410_s22, %s406_s14 }
  0x2f   : > { %144 = vmin.xlane.f32.xlu0 %v143_v6 }
  0x30   : > { %p408_p9 = pnand %p407_p6, %p522_p11  ;;  %p413_p3 = por %p412_p1, %p411_p0 }
  0x32   : > { %p409_p13 = pneg %p408_p9 }
  0x34   : > { %p414_p4 = pnand %p413_p3, %p409_p13 }
  0x37   : > { %156 = vmax.xlane.f32.xlu0 %v155_v9 }
  0xa2   : > { %v145_v10 = vpop.xlane.xlu0 %144 }
  0xa3   : > { %v146_v11 = vrot.slane %v145_v10, 4 }
  0xa5   : > { %v147_v12 = vmin.f32 %v145_v10, %v146_v11 }
  0xa7   : > { %v148_v13 = vrot.slane %v147_v12, 2 }
  0xa9   : > { %v149_v14 = vmin.f32 %v147_v12, %v148_v13 }
  0xaa   : > { %v157_v15 = vpop.xlane.xlu0 %156 }
  0xab   : > { %v158_v16 = vrot.slane %v157_v15, 4  ;;  %v150_v17 = vrot.slane %v149_v14, 1 }
  0xad   : > { %v159_v18 = vmax.f32 %v157_v15, %v158_v16  ;;  %v151_v19 = vmin.f32 %v149_v14, %v150_v17 }
  0xaf   : > { %v160_v20 = vrot.slane %v159_v18, 2  ;;  %302 = vpush %v151_v19 }
  0xb1   : > { %v161_v21 = vmax.f32 %v159_v18, %v160_v20 }
  0xb3   : > { %v162_v22 = vrot.slane %v161_v21, 1 }
  0xb5   : > { %v163_v23 = vmax.f32 %v161_v21, %v162_v22 }
  0xb7   : > { %304 = vpush %v163_v23 }
  0xe0   : > { %s303_s17 = spop %302 }
  0xe1   : > { %v183_v35 = vstv %s303_s17 }
  0xe2   : > { %v184_v36 = vsub.f32 %v137_v0, %v183_v35  ;;  %v185_v37 = vsub.f32 %v138_v1, %v183_v35  ;;  %v186_v38 = vsub.f32 %v139_v2, %v183_v35  ;;  %v187_v39 = vsub.f32 %v140_v3, %v183_v35 }
  0xe8   : > { %s305_s25 = spop %304 }
  0xe9   : > { %s165_s26 = ssub.f32 %s305_s25, %s303_s17 }
  0xeb   : > { %s166_s27 = sadd.f32 0.01, %s165_s26 }
  0xed   : > { %v167_v24 = vstv %s166_s27 }
  0xee   : > { %358 = vrcp.f32 %v167_v24  ;;  %v179_v28 = vand.u32 2147483648, %v167_v24  ;;  %v177_v30 = vand.u32 2147483647, %v167_v24  ;;  %vm173_vm1 = vweird.f32 %v167_v24 }
  0xf0   : > { %v180_v32 = vor.u32 1.1754944e-38, %v179_v28  ;;  %vm178_vm3 = vcmp.eq.f32.partialorder %v177_v30, 8.507059e+37 }
  0xf4   : > { %v359_v25 = vpop.eup %358 }
  0xf5   : > { %v169_v26 = vmul.f32 %v359_v25, %v167_v24  ;;  %vm174_vm0 = vweird.f32 %v359_v25 }
  0xf6   : > { %vm175_vm2 = vmor %vm173_vm1, %vm174_vm0 }
  0xf7   : > { %v170_v27 = vsub.f32 1.0, %v169_v26 }
  0xf9   : > { %v171_v29 = vmul.f32 %v359_v25, %v170_v27 }
  0xfb   : > { %v172_v31 = vadd.f32 %v359_v25, %v171_v29 }
  0xfd   : > { %v176_v33 = vsel %vm175_vm2, %v359_v25, %v172_v31 }
  0xfe   : > { %v181_v34 = vsel %vm178_vm3, %v180_v32, %v176_v33 }
  0xff   : > { %306 = vpush %v181_v34 }
 0x130   : > { %s307_s3 = spop %306 }
 0x131   : > { %v188_v40 = vstv %s307_s3 }
 0x132   : > { %v189_v41 = vmul.f32 %v188_v40, %v184_v36  ;;  %v190_v42 = vmul.f32 %v188_v40, %v185_v37  ;;  %v191_v43 = vmul.f32 %v188_v40, %v186_v38  ;;  %v192_v44 = vmul.f32 %v188_v40, %v187_v39 }
 0x134   : > { %193 = vst [vmem:[%s136_s4] sm:$0xff] %v189_v41 }
 0x135   : > { %194 = vst [vmem:[%s136_s4 + $0x8] sm:$0xff] %v190_v42 }
 0x136   : > { %195 = vst [vmem:[%s136_s4 + $0x10] sm:$0xff] %v191_v43 }
 0x137   : > { %196 = vst [vmem:[%s136_s4 + $0x18] sm:$0xff] %v192_v44 }
 0x138   : > { %417 = shalt.err (!%p414_p4)
}
 0x139   : > { %s460_s21 = smov 128   ;;  %s461_s17 = smov 8  }
 0x13a   : > { %310 = dma.vmem_to_hbm [thread:$0]  (%p522_p11), %s211_s5, 512, %s213_s11, %s198_s10, %s460_s21, %s460_s21, %s461_s17  }
 0x13b PF: > { %s227_s25 = sand.u32 1, %s444_s6   ;;  %p610_p7 = scmp.ge.s32.totalorder %s456_s9, 2 }
 0x13c   : > { %s228_s26 = scalar_lea.sflag [#allocation4], %s227_s25 }
 0x13d   : > { %p317_p5 = pnand %p610_p7, %p526_p12 }
 0x13f   : > { %p318_p8 = pneg %p317_p5 }
 0x141   : > { %439 = dma.done.wait (%p318_p8), %s228_s26, 512  }
 0x142   : > { %441 = vsyncadd (%p318_p8), %s228_s26, 4294966784  ;;  %p14_p10 = scmp.ge.s32.totalorder %s497_s12, 4   ;;  %s611_s6 = smov %s448_s7 }
 0x143   : > { %s612_s7 = smov %s452_s8  ;;  %s613_s8 = smov %s509_s15 }
 0x144   : > { %s614_s9 = smov %s497_s12  ;;  %16 = sbr.rel (!%p14_p10) target bundleno = 5 (0x5), region = 69 }
 0x149   :  { %234 = vsyncpa [#allocation3], 1 }
 0x14a   :  { %236 = vsyncpa [#allocation3 + $0x1], 1 }
 0x14b   :  { %237 = vsyncpa [#allocation4], 1 }
 0x14c   :  { %239 = vsyncpa [#allocation4 + $0x1], 1 }

</bundles_post_ra>
